<compile_context>
chip_gen: v6e
topology: v6e:2x2x1
jax: 0.10.0
libtpu: 0.0.40
codegen_flags: <defaults>
</compile_context>

<pallas_src>
import jax
import jax.numpy as jnp
from jax.experimental import pallas as pl
from jax.experimental.pallas import tpu as pltpu


def rezero_kernel(alpha_ref, x_ref, f_ref, o_ref):
    # alpha_ref: SMEM (1,) scalar parameter
    # x_ref/f_ref/o_ref: VMEM tiles of shape (block_rows, lanes)
    alpha = alpha_ref[0].astype(jnp.float32)
    x = x_ref[...].astype(jnp.float32)
    f = f_ref[...].astype(jnp.float32)
    o_ref[...] = (x + alpha * f).astype(o_ref.dtype)


def _device_profile():
    """(target tile bytes per input stream, num TensorCores) for the local TPU."""
    kind = ""
    try:
        kind = jax.devices()[0].device_kind.lower()
    except Exception:
        pass
    if "v7" in kind:
        # v7x: ~3.2 TB/s HBM -> amortize the ~0.35us grid-step cost with big tiles.
        return 6 * 1024 * 1024, 2
    if "v6" in kind:
        return 4 * 1024 * 1024, 1
    # v5e / unknown: 2 MiB already puts the step overhead <5%; 12 MiB total
    # footprint fits the 16 MiB scoped-VMEM default.
    return 2 * 1024 * 1024, 1


def _lane_dense_layout(total):
    """Pick (rows, lanes, pad_elems) so the last dim is a large multiple of 128."""
    for lanes in (1024, 512, 256, 128):
        if total % lanes == 0:
            return total // lanes, lanes, 0
    # Pad the flat slab to a multiple of 128 lanes (avoid masked vst.msk stores).
    lanes = 128
    padded = -(-total // lanes) * lanes
    return padded // lanes, lanes, padded - total


def _pick_block_rows(rows, lanes, itemsize, target_bytes, num_cores):
    """Block row count: multiple of the sublane size or the full row extent."""
    sub = max(8, 32 // itemsize)          # 8 (f32), 16 (bf16), 32 (i8)
    if rows <= sub:
        return rows                       # tiny input: single full-extent block
    bytes_per_row = lanes * itemsize
    block = max(sub, (target_bytes // bytes_per_row) // sub * sub)
    if num_cores > 1:
        # Keep >= 2 grid steps per TensorCore so the core split has work.
        cap = (rows // (2 * num_cores)) // sub * sub
        if cap >= sub:
            block = min(block, cap)
    if block >= rows:
        return rows                       # single full-extent block
    # Prefer a divisor of rows near the target so there is no ragged tail block
    # (accept at most 2x more grid steps than the target block would give).
    for d in range(block, max(sub, block // 2) - 1, -sub):
        if rows % d == 0:
            return d
    return block                          # ragged tail: correct, slightly wasteful


def rezero(inputs, function, alpha):
    """ReZero forward: inputs + alpha * function (elementwise, scalar broadcast)."""
    assert inputs.shape == function.shape
    orig_shape = inputs.shape
    dtype = inputs.dtype
    total = inputs.size
    itemsize = jnp.dtype(dtype).itemsize

    target_bytes, num_cores = _device_profile()
    rows, lanes, pad = _lane_dense_layout(total)

    x_flat = inputs.reshape(-1)
    f_flat = function.reshape(-1)
    if pad:
        x_flat = jnp.pad(x_flat, (0, pad))
        f_flat = jnp.pad(f_flat, (0, pad))
    x2 = x_flat.reshape(rows, lanes)
    f2 = f_flat.reshape(rows, lanes)

    block_rows = _pick_block_rows(rows, lanes, itemsize, target_bytes, num_cores)
    grid = (pl.cdiv(rows, block_rows),)

    # Right-size the scoped-VMEM request: 3 streams x 2 pipeline buffers x tile,
    # plus margin for compiler scratch; never below the 16 MiB default, capped
    # well under v7x's 64 MiB physical VMEM per TC.
    tile_bytes = block_rows * lanes * itemsize
    vmem_limit = int(3 * 2 * tile_bytes * 1.25) + (2 << 20)
    vmem_limit = max(16 << 20, min(vmem_limit, 48 << 20))

    # Only CORE_PARALLEL actually splits a grid axis across TensorCores; use it
    # on multi-TC chips (v7x) when there is enough work, else plain "parallel".
    if num_cores > 1 and hasattr(pltpu, "CORE_PARALLEL") and grid[0] >= 2 * num_cores:
        dim_sem = (pltpu.CORE_PARALLEL,)
    else:
        dim_sem = ("parallel",)

    alpha_arr = jnp.asarray(alpha, dtype=jnp.float32).reshape(-1)

    out = pl.pallas_call(
        rezero_kernel,
        out_shape=jax.ShapeDtypeStruct((rows, lanes), dtype),
        grid=grid,
        in_specs=[
            pl.BlockSpec(memory_space=pltpu.SMEM),                  # alpha scalar
            pl.BlockSpec((block_rows, lanes), lambda i: (i, 0)),    # inputs
            pl.BlockSpec((block_rows, lanes), lambda i: (i, 0)),    # function
        ],
        out_specs=pl.BlockSpec((block_rows, lanes), lambda i: (i, 0)),
        compiler_params=pltpu.CompilerParams(
            dimension_semantics=dim_sem,
            vmem_limit_bytes=vmem_limit,
        ),
    )(alpha_arr, x2, f2)

    out_flat = out.reshape(-1)
    if pad:
        out_flat = out_flat[:total]
    return out_flat.reshape(orig_shape)


if __name__ == "__main__":
    key = jax.random.PRNGKey(0)
    k1, k2, k3, k4, k5, k6 = jax.random.split(key, 6)

    # Parameter init matches nn.Parameter(torch.zeros(1)); also test alpha != 0.
    alpha_init = jnp.zeros((1,), dtype=jnp.float32)
    alpha_test = jnp.array([0.37], dtype=jnp.float32)

    # Small shape consistent with the module's forward.
    batch, seq, hidden = 2, 8, 32
    inputs = jax.random.normal(k1, (batch, seq, hidden), dtype=jnp.float32)
    function = jax.random.normal(k2, (batch, seq, hidden), dtype=jnp.float32)

    out_init = rezero(inputs, function, alpha_init)
    out_test = rezero(inputs, function, alpha_test)
    jax.block_until_ready((out_init, out_test))
    assert jnp.allclose(out_init, inputs + alpha_init[0] * function, atol=1e-6), \
        "mismatch (small, alpha=0)"
    assert jnp.allclose(out_test, inputs + alpha_test[0] * function, atol=1e-6), \
        "mismatch (small, alpha!=0)"

    # Medium shape: exercises the lane-dense reshape and a multi-step grid.
    b2, s2, h2 = 8, 256, 1024
    x_m = jax.random.normal(k3, (b2, s2, h2), dtype=jnp.float32)
    f_m = jax.random.normal(k4, (b2, s2, h2), dtype=jnp.float32)
    out_m = rezero(x_m, f_m, alpha_test)
    jax.block_until_ready(out_m)
    assert jnp.allclose(out_m, x_m + alpha_test[0] * f_m, atol=1e-6), \
        "mismatch (medium, alpha!=0)"

    # Awkward shape: total not a multiple of 128 -> exercises the pad/slice path.
    x_p = jax.random.normal(k5, (2, 7, 30), dtype=jnp.float32)
    f_p = jax.random.normal(k6, (2, 7, 30), dtype=jnp.float32)
    out_p = rezero(x_p, f_p, alpha_test)
    jax.block_until_ready(out_p)
    assert jnp.allclose(out_p, x_p + alpha_test[0] * f_p, atol=1e-6), \
        "mismatch (padded, alpha!=0)"

    # bf16 path: FMA computed in f32 inside the kernel, cast once at the store.
    x_b = jax.random.normal(k3, (4, 64, 256), dtype=jnp.bfloat16)
    f_b = jax.random.normal(k4, (4, 64, 256), dtype=jnp.bfloat16)
    out_b = rezero(x_b, f_b, alpha_test)
    jax.block_until_ready(out_b)
    ref_b = (x_b.astype(jnp.float32) + alpha_test[0] * f_b.astype(jnp.float32)
             ).astype(jnp.bfloat16)
    assert jnp.allclose(out_b.astype(jnp.float32), ref_b.astype(jnp.float32),
                        atol=1e-2), "mismatch (bf16, alpha!=0)"

    print("KERNEL_OK")
</pallas_src>

<mosaic_0001>
module attributes {stable_mosaic.version = 11 : i64} {
  func.func @rezero_kernel(%arg0: i32, %arg1: memref<1xf32, #tpu.memory_space<smem>>, %arg2: memref<1x512xf32, #tpu.memory_space<vmem>>, %arg3: memref<1x512xf32, #tpu.memory_space<vmem>>, %arg4: memref<1x512xf32, #tpu.memory_space<vmem>>) attributes {dimension_semantics = [#tpu.dimension_semantics<parallel>], iteration_bounds = array<i64: 1>, scalar_prefetch = 0 : i64, scratch_operands = 0 : i64, tpu.core_type = #tpu.core_type<tc>, window_params = [{transform_indices = @transform_0, window_bounds = array<i64: 1>}, {transform_indices = @transform_1, window_bounds = array<i64: 1, 512>}, {transform_indices = @transform_2, window_bounds = array<i64: 1, 512>}, {transform_indices = @transform_3, window_bounds = array<i64: 1, 512>}]} {
    %c0 = arith.constant 0 : index
    %0 = memref.load %arg1[%c0] : memref<1xf32, #tpu.memory_space<smem>>
    %c0_0 = arith.constant 0 : index
    %c0_1 = arith.constant 0 : index
    %1 = vector.load %arg2[%c0_0, %c0_1] : memref<1x512xf32, #tpu.memory_space<vmem>>, vector<1x512xf32>
    %c0_2 = arith.constant 0 : index
    %c0_3 = arith.constant 0 : index
    %2 = vector.load %arg3[%c0_2, %c0_3] : memref<1x512xf32, #tpu.memory_space<vmem>>, vector<1x512xf32>
    %3 = vector.broadcast %0 : f32 to vector<1x512xf32>
    %4 = arith.mulf %3, %2 : vector<1x512xf32>
    %5 = arith.addf %1, %4 : vector<1x512xf32>
    %c0_4 = arith.constant 0 : index
    %c0_5 = arith.constant 0 : index
    %6 = vector.load %arg4[%c0_4, %c0_5] : memref<1x512xf32, #tpu.memory_space<vmem>>, vector<1x512xf32>
    tpu.vector_store %arg4[%c0_4, %c0_5], %5 {strides = array<i32>} : memref<1x512xf32, #tpu.memory_space<vmem>>, vector<1x512xf32>,
    return
  }
  func.func @transform_0(%arg0: i32) -> i32 {
    %c0_i32 = arith.constant 0 : i32
    %c0_i32_0 = arith.constant 0 : i32
    return %c0_i32 : i32
  }
  func.func @transform_1(%arg0: i32) -> (i32, i32) {
    %c0_i32 = arith.constant 0 : i32
    %c0_i32_0 = arith.constant 0 : i32
    return %arg0, %c0_i32 : i32, i32
  }
  func.func @transform_2(%arg0: i32) -> (i32, i32) {
    %c0_i32 = arith.constant 0 : i32
    %c0_i32_0 = arith.constant 0 : i32
    return %arg0, %c0_i32 : i32, i32
  }
  func.func @transform_3(%arg0: i32) -> (i32, i32) {
    %c0_i32 = arith.constant 0 : i32
    %c0_i32_0 = arith.constant 0 : i32
    return %arg0, %c0_i32 : i32, i32
  }
}

</mosaic_0001>

<bundles_post_ra>
// kernel: tpu_custom_call.1
= control target key start
LH: loop header
LB: loop body
LE: loop exit
PB: predicated region body
PF: predicated region fallthrough
CT: control target
= control target key end

     0   :  { %9 = vsyncpa [#allocation4], 0  ;;  %s171_s0 = inlined_call_operand.<no memory space> [shape: f32[1], index: 0, kind: input, shape index: {}]   ;;  %s172_s1 = inlined_call_operand.hbm [shape: f32[1,512], index: 1, kind: input, shape index: {}]   ;;  %s173_s2 = inlined_call_operand.hbm [shape: f32[1,512], index: 2, kind: input, shape index: {}]   ;;  %s174_s3 = inlined_call_operand.hbm [shape: f32[1,512], index: 3, kind: output, shape index: {}]  }
   0x1   :  { %10 = vsyncpa [#allocation7], 0 }
   0x2   :  { %11 = vsyncpa [#allocation5], 0  ;;  %s136_s12 = smov [#allocation3]   ;;  %s137_s14 = smov [#allocation6]  }
   0x3   :  { %s20_s13 = sshll.u32 %s136_s12, 4  ;;  %s30_s15 = sshll.u32 %s137_s14, 4  ;;  %s21_s13 = int_to_ptr.vmem [resolvable:$true] %s20_s13  ;;  %s31_s15 = int_to_ptr.vmem [resolvable:$true] %s30_s15 }
   0x4   :  { %s78_s16 = scalar_lea.vmem %s21_s13, 64  ;;  %p83_p1 = scmp.lt.s32.totalorder %s21_s13, %s21_s13 }
   0x5   :  { %p79_p0 = scmp.ne.s32.totalorder %s21_s13, %s78_s16  ;;  %p84_p2 = scmp.lt.s32.totalorder %s78_s16, %s78_s16 }
   0x7   :  { %p85_p3 = por %p84_p2, %p83_p1 }
   0x9   :  { %p86_p4 = pnand %p85_p3, %p79_p0 }
   0xb   :  { %89 = shalt.err (!%p86_p4)
}
   0xc   :  { %23 = dma.hbm_to_vmem [thread:$0]  %s172_s1, 64, %s21_s13, [#allocation4]  }
   0xd   :  { %s98_s19 = scalar_lea.vmem %s31_s15, 64  ;;  %p103_p6 = scmp.lt.s32.totalorder %s31_s15, %s31_s15 }
   0xe   :  { %p99_p5 = scmp.ne.s32.totalorder %s31_s15, %s98_s19  ;;  %p104_p7 = scmp.lt.s32.totalorder %s98_s19, %s98_s19 }
  0x10   :  { %p105_p8 = por %p104_p7, %p103_p6 }
  0x12   :  { %p106_p9 = pnand %p105_p8, %p99_p5 }
  0x14   :  { %109 = shalt.err (!%p106_p9)
}
  0x15   :  { %33 = dma.hbm_to_vmem [thread:$0]  %s173_s2, 64, %s31_s15, [#allocation7]  }
  0x16   :  { %130 = dma.done.wait [#allocation4], 64  }
  0x17   :  { %131 = vsyncadd [#allocation4], 4294967232 }
  0x18   :  { %132 = dma.done.wait [#allocation7], 64  }
  0x19   :  { %133 = vsyncadd [#allocation7], 4294967232  ;;  %v43_v0 = vstv %s171_s0  ;;  %v46_v1 = vlaneseq  ;;  %v41_v2 = vld [vmem:[#allocation3] sm:$0xf]  ;;  %v42_v3 = vld [vmem:[#allocation6] sm:$0xf] }
  0x1a   :  { %s138_s1 = smov [#allocation8]   ;;  %v44_v4 = vmul.f32 %v43_v0, %v42_v3 }
  0x1b   :  { %s57_s24 = sshll.u32 %s138_s1, 4  ;;  %vm48_vm0 = vcmp.lt.s32.totalorder %v46_v1, 512  ;;  %s58_s24 = int_to_ptr.vmem [resolvable:$true] %s57_s24 }
  0x1c   :  { %v45_v5 = vadd.f32 %v44_v4, %v41_v2  ;;  %s110_s25 = scalar_lea.vmem %s58_s24, 64  ;;  %p115_p11 = scmp.lt.s32.totalorder %s58_s24, %s58_s24 }
  0x1d   :  { %p111_p10 = scmp.ne.s32.totalorder %s58_s24, %s110_s25  ;;  %p116_p12 = scmp.lt.s32.totalorder %s110_s25, %s110_s25 }
  0x1e   :  { %50 = vst.msk [vmem:[#allocation8] sm:$0xf] %vm48_vm0, %v45_v5 }
  0x1f   :  { %p117_p13 = por %p116_p12, %p115_p11 }
  0x21   :  { %p118_p0 = pnand %p117_p13, %p111_p10 }
  0x23   :  { %121 = shalt.err (!%p118_p0)
}
  0x24   :  { %60 = dma.vmem_to_hbm [thread:$0]  %s58_s24, 64, %s174_s3, [#allocation5]  }
  0x25   :  { %134 = dma.done.wait [#allocation5], 64  }
  0x26   :  { %135 = vsyncadd [#allocation5], 4294967232 }
  0x27   :  { %64 = vsyncpa [#allocation4], 1 }
  0x28   :  { %65 = vsyncpa [#allocation7], 1 }
  0x29   :  { %66 = vsyncpa [#allocation5], 1 }

</bundles_post_ra>
